<compile_context>
chip_gen: v6e
topology: v6e:2x2x1
jax: 0.10.0
libtpu: 0.0.40
codegen_flags: <defaults>
</compile_context>

<pallas_src>
import jax
import jax.numpy as jnp
from jax.experimental import pallas as pl
from jax.experimental.pallas import tpu as pltpu


# Packed parameter slab layout (rows x 128 lanes, f32):
#   rows   0:128  -> fc2 weight (128,64) zero-padded to (128,128)
#   rows 128:256  -> fused head weight (128,128):
#                      rows 0:64 real (h2 features), rows 64:128 zero
#                      lane 0,1  = actor weight cols 0,1
#                      lane 2    = value weight
#                      lane 64   = actor weight col 1   (swapped copy)
#                      lane 65   = actor weight col 0   (swapped copy)
#   row  256      -> fc1 bias (128)
#   row  257      -> fc2 bias zero-padded to 128
#   row  258      -> head bias: lanes 0,1 = actor bias; lane 2 = value bias;
#                    lanes 64,65 = swapped actor bias copies
#   rows 259:264  -> zero padding (keeps row count a multiple of 8)
_SLAB_ROWS = 264


def _a2c_kernel(x_ref, w1_ref, p_ref, out_ref):
    x = x_ref[...]                                            # (B, 4)

    # fc1 + ReLU (K=4 matmul; kept on the MXU for simplicity).
    h1 = jnp.dot(x, w1_ref[...], preferred_element_type=jnp.float32)
    h1 = jnp.maximum(h1 + p_ref[256:257, :], 0.0)             # (B, 128)

    # fc2 (zero-padded to 128 output lanes) + ReLU; lanes 64: stay exactly 0.
    h2 = jnp.dot(h1, p_ref[0:128, :], preferred_element_type=jnp.float32)
    h2 = jnp.maximum(h2 + p_ref[257:258, :], 0.0)             # (B, 128)

    # Fused actor+value head: one lane-dense (B,128) result.
    o = jnp.dot(h2, p_ref[128:256, :], preferred_element_type=jnp.float32)
    o = o + p_ref[258:259, :]                                 # (B, 128)

    # Reduce-free 2-way log-softmax: partner[:, i] = o[:, (i + 64) % 128],
    # so lanes 0/1 see each other's logit (copies were planted at 64/65).
    partner = pltpu.roll(o, shift=64, axis=1)
    m = jnp.maximum(o, partner)
    lse = m + jnp.log(jnp.exp(o - m) + jnp.exp(partner - m))
    logp = o - lse                                            # valid at lanes 0,1

    # Sigmoid via EUP approx reciprocal (valid at lane 2).
    sig = pl.reciprocal(1.0 + jnp.exp(-o), approx=True)

    lane = jax.lax.broadcasted_iota(jnp.int32, o.shape, 1)
    out_ref[...] = jnp.where(lane < 2, logp,
                             jnp.where(lane == 2, sig, 0.0))


@jax.jit
def cartpole_a2c_forward(x, w1, param_slab):
    """x: (B,4) f32; w1: (4,128) f32; param_slab: (264,128) f32.
    Returns (log_probs (B,2), value (B,1))."""
    B = x.shape[0]
    out = pl.pallas_call(
        _a2c_kernel,
        out_shape=jax.ShapeDtypeStruct((B, 128), jnp.float32),
    )(x, w1, param_slab)
    return out[:, 0:2], out[:, 2:3]


def init_params(key):
    """nn.Linear-style init (uniform +/- 1/sqrt(fan_in)); weights in (in,out) layout."""
    def linear(k, fan_in, fan_out):
        kw, kb = jax.random.split(k)
        bound = 1.0 / jnp.sqrt(fan_in)
        w = jax.random.uniform(kw, (fan_in, fan_out), jnp.float32, -bound, bound)
        b = jax.random.uniform(kb, (fan_out,), jnp.float32, -bound, bound)
        return w, b

    k1, k2, k3, k4 = jax.random.split(key, 4)
    w1, b1 = linear(k1, 4, 128)
    w2, b2 = linear(k2, 128, 64)
    wa, ba = linear(k3, 64, 2)
    wv, bv = linear(k4, 64, 1)
    return {"w1": w1, "b1": b1, "w2": w2, "b2": b2,
            "wa": wa, "ba": ba, "wv": wv, "bv": bv}


def pack_params(p):
    """Build (w1, param_slab) for the kernel. Done once at param-prep time."""
    w2p = jnp.zeros((128, 128), jnp.float32).at[:, :64].set(p["w2"])

    whp = jnp.zeros((128, 128), jnp.float32)
    whp = whp.at[:64, 0:2].set(p["wa"])
    whp = whp.at[:64, 2:3].set(p["wv"])
    whp = whp.at[:64, 64].set(p["wa"][:, 1])   # swapped copies for roll-based LSE
    whp = whp.at[:64, 65].set(p["wa"][:, 0])

    bias = jnp.zeros((8, 128), jnp.float32)
    bias = bias.at[0, :].set(p["b1"])
    bias = bias.at[1, :64].set(p["b2"])
    bias = bias.at[2, 0:2].set(p["ba"])
    bias = bias.at[2, 2].set(p["bv"][0])
    bias = bias.at[2, 64].set(p["ba"][1])
    bias = bias.at[2, 65].set(p["ba"][0])

    slab = jnp.concatenate([w2p, whp, bias], axis=0)  # (264, 128)
    assert slab.shape == (_SLAB_ROWS, 128)
    return p["w1"], slab


def reference_forward(x, p):
    h1 = jnp.maximum(x @ p["w1"] + p["b1"], 0.0)
    h2 = jnp.maximum(h1 @ p["w2"] + p["b2"], 0.0)
    logits = h2 @ p["wa"] + p["ba"]
    logp = jax.nn.log_softmax(logits, axis=-1)
    value = jax.nn.sigmoid(h2 @ p["wv"] + p["bv"])
    return logp, value


if __name__ == "__main__":
    key = jax.random.PRNGKey(0)
    kx, kp = jax.random.split(key)

    B = 8  # small batch of CartPole observations (state dim = 4)
    x = jax.random.normal(kx, (B, 4), dtype=jnp.float32)
    params = init_params(kp)
    w1, slab = pack_params(params)

    log_probs, value = cartpole_a2c_forward(x, w1, slab)
    jax.block_until_ready((log_probs, value))

    ref_lp, ref_v = reference_forward(x, params)
    assert log_probs.shape == (B, 2) and value.shape == (B, 1)
    assert jnp.allclose(log_probs, ref_lp, atol=1e-4, rtol=1e-4)
    # value uses pl.reciprocal(approx=True) -> slightly looser tolerance
    assert jnp.allclose(value, ref_v, atol=1e-2, rtol=1e-2)

    print("KERNEL_OK")
</pallas_src>

<mosaic_0001>
module attributes {stable_mosaic.version = 11 : i64} {
  func.func @_a2c_kernel(%arg0: memref<8x4xf32, #tpu.memory_space<vmem>>, %arg1: memref<4x128xf32, #tpu.memory_space<vmem>>, %arg2: memref<264x128xf32, #tpu.memory_space<vmem>>, %arg3: memref<8x128xf32, #tpu.memory_space<vmem>>) attributes {dimension_semantics = [], scalar_prefetch = 0 : i64, scratch_operands = 0 : i64, tpu.core_type = #tpu.core_type<tc>} {
    %c0 = arith.constant 0 : index
    %c0_0 = arith.constant 0 : index
    %0 = vector.load %arg0[%c0, %c0_0] : memref<8x4xf32, #tpu.memory_space<vmem>>, vector<8x4xf32>
    %c0_1 = arith.constant 0 : index
    %c0_2 = arith.constant 0 : index
    %1 = vector.load %arg1[%c0_1, %c0_2] : memref<4x128xf32, #tpu.memory_space<vmem>>, vector<4x128xf32>
    %cst = arith.constant dense<0.000000e+00> : vector<8x128xf32>
    %2 = tpu.matmul %0, %1, %cst {dimension_numbers = #tpu.dot_dimension_numbers<[1], [0], [0], [1], [0, 0, 1, 1], [], []>} : vector<8x4xf32>, vector<4x128xf32>, vector<8x128xf32> -> vector<8x128xf32>
    %c256 = arith.constant 256 : index
    %c0_3 = arith.constant 0 : index
    %3 = vector.load %arg2[%c256, %c0_3] : memref<264x128xf32, #tpu.memory_space<vmem>>, vector<1x128xf32>
    %4 = vector.broadcast %3 : vector<1x128xf32> to vector<8x128xf32>
    %5 = arith.addf %2, %4 : vector<8x128xf32>
    %cst_4 = arith.constant 0.000000e+00 : f32
    %6 = vector.broadcast %cst_4 : f32 to vector<8x128xf32>
    %7 = arith.maximumf %5, %6 : vector<8x128xf32>
    %c0_5 = arith.constant 0 : index
    %c0_6 = arith.constant 0 : index
    %8 = vector.load %arg2[%c0_5, %c0_6] : memref<264x128xf32, #tpu.memory_space<vmem>>, vector<128x128xf32>
    %cst_7 = arith.constant dense<0.000000e+00> : vector<8x128xf32>
    %9 = tpu.matmul %7, %8, %cst_7 {dimension_numbers = #tpu.dot_dimension_numbers<[1], [0], [0], [1], [0, 0, 1, 1], [], []>} : vector<8x128xf32>, vector<128x128xf32>, vector<8x128xf32> -> vector<8x128xf32>
    %c257 = arith.constant 257 : index
    %c0_8 = arith.constant 0 : index
    %10 = vector.load %arg2[%c257, %c0_8] : memref<264x128xf32, #tpu.memory_space<vmem>>, vector<1x128xf32>
    %11 = vector.broadcast %10 : vector<1x128xf32> to vector<8x128xf32>
    %12 = arith.addf %9, %11 : vector<8x128xf32>
    %cst_9 = arith.constant 0.000000e+00 : f32
    %13 = vector.broadcast %cst_9 : f32 to vector<8x128xf32>
    %14 = arith.maximumf %12, %13 : vector<8x128xf32>
    %c128 = arith.constant 128 : index
    %c0_10 = arith.constant 0 : index
    %15 = vector.load %arg2[%c128, %c0_10] : memref<264x128xf32, #tpu.memory_space<vmem>>, vector<128x128xf32>
    %cst_11 = arith.constant dense<0.000000e+00> : vector<8x128xf32>
    %16 = tpu.matmul %14, %15, %cst_11 {dimension_numbers = #tpu.dot_dimension_numbers<[1], [0], [0], [1], [0, 0, 1, 1], [], []>} : vector<8x128xf32>, vector<128x128xf32>, vector<8x128xf32> -> vector<8x128xf32>
    %c258 = arith.constant 258 : index
    %c0_12 = arith.constant 0 : index
    %17 = vector.load %arg2[%c258, %c0_12] : memref<264x128xf32, #tpu.memory_space<vmem>>, vector<1x128xf32>
    %18 = vector.broadcast %17 : vector<1x128xf32> to vector<8x128xf32>
    %19 = arith.addf %16, %18 : vector<8x128xf32>
    %c64_i32 = arith.constant 64 : i32
    %20 = tpu.dynamic_rotate %19 by %c64_i32 dim 1 : vector<8x128xf32>, i32 -> vector<8x128xf32>
    %21 = arith.maximumf %19, %20 : vector<8x128xf32>
    %22 = arith.subf %19, %21 : vector<8x128xf32>
    %23 = math.exp %22 : vector<8x128xf32>
    %24 = arith.subf %20, %21 : vector<8x128xf32>
    %25 = math.exp %24 : vector<8x128xf32>
    %26 = arith.addf %23, %25 : vector<8x128xf32>
    %27 = math.log %26 : vector<8x128xf32>
    %28 = arith.addf %21, %27 : vector<8x128xf32>
    %29 = arith.subf %19, %28 : vector<8x128xf32>
    %cst_13 = arith.constant 0.000000e+00 : f32
    %30 = vector.broadcast %cst_13 : f32 to vector<8x128xf32>
    %31 = arith.subf %30, %19 : vector<8x128xf32>
    %32 = math.exp %31 : vector<8x128xf32>
    %cst_14 = arith.constant 1.000000e+00 : f32
    %33 = vector.broadcast %cst_14 : f32 to vector<8x128xf32>
    %34 = arith.addf %33, %32 : vector<8x128xf32>
    %35 = tpu.reciprocal %34 {approx = true} : vector<8x128xf32> -> vector<8x128xf32>
    %36 = tpu.iota {dimensions = array<i32: 1>} : vector<8x128xi32>
    %c2_i32 = arith.constant 2 : i32
    %37 = vector.broadcast %c2_i32 : i32 to vector<8x128xi32>
    %38 = arith.cmpi slt, %36, %37 : vector<8x128xi32>
    %c2_i32_15 = arith.constant 2 : i32
    %39 = vector.broadcast %c2_i32_15 : i32 to vector<8x128xi32>
    %40 = arith.cmpi eq, %36, %39 : vector<8x128xi32>
    %cst_16 = arith.constant 0.000000e+00 : f32
    %41 = vector.broadcast %cst_16 : f32 to vector<8x128xf32>
    %42 = arith.select %40, %35, %41 : vector<8x128xi1>, vector<8x128xf32>
    %43 = arith.select %38, %29, %42 : vector<8x128xi1>, vector<8x128xf32>
    %c0_17 = arith.constant 0 : index
    %c0_18 = arith.constant 0 : index
    %44 = vector.load %arg3[%c0_17, %c0_18] : memref<8x128xf32, #tpu.memory_space<vmem>>, vector<8x128xf32>
    tpu.vector_store %arg3[%c0_17, %c0_18], %43 {strides = array<i32>} : memref<8x128xf32, #tpu.memory_space<vmem>>, vector<8x128xf32>,
    return
  }
}

</mosaic_0001>

<bundles_post_ra>
// kernel: cartpole_a2c_forward.1
= control target key start
LH: loop header
LB: loop body
LE: loop exit
PB: predicated region body
PF: predicated region fallthrough
CT: control target
= control target key end

     0   :  { %8 = vsyncpa [#allocation3], 0  ;;  %s482_s12 = smov [#allocation2]   ;;  %s559_s0 = inlined_call_operand.vmem [shape: f32[8,4], index: 0, kind: input, shape index: {}]   ;;  %s560_s1 = inlined_call_operand.vmem [shape: f32[4,128], index: 1, kind: input, shape index: {}]   ;;  %s561_s2 = inlined_call_operand.hbm [shape: f32[264,128], index: 2, kind: input, shape index: {}]   ;;  %s562_s3 = inlined_call_operand.vmem [shape: f32[8,128], index: 3, kind: output, shape index: {}]  }
   0x1   :  { %s18_s13 = sshll.u32 %s482_s12, 4  ;;  %s19_s13 = int_to_ptr.vmem [resolvable:$true] %s18_s13 }
   0x2   :  { %s468_s14 = scalar_lea.vmem %s19_s13, 4224  ;;  %p473_p1 = scmp.lt.s32.totalorder %s19_s13, %s19_s13 }
   0x3   :  { %p469_p0 = scmp.ne.s32.totalorder %s19_s13, %s468_s14  ;;  %p474_p2 = scmp.lt.s32.totalorder %s468_s14, %s468_s14 }
   0x5   :  { %p475_p3 = por %p474_p2, %p473_p1 }
   0x7   :  { %p476_p4 = pnand %p475_p3, %p469_p0 }
   0x9   :  { %479 = shalt.err (!%p476_p4)
}
   0xa   :  { %s483_s15 = smov 128   ;;  %s484_s16 = smov 8  }
   0xb   :  { %24 = dma.hbm_to_vmem [thread:$0]  %s561_s2, 4224, %s19_s13, [#allocation3], %s483_s15, %s483_s15, %s484_s16  }
   0xc   :  { %480 = dma.done.wait [#allocation3], 4224  }
   0xd   :  { %481 = vsyncadd [#allocation3], 4294963072  ;;  %v485_v0 = vmov 0.0   ;;  %vm486_vm0 = vmmov 0   ;;  %vm39_vm1 = vcmask 1043456   ;;  %vm35_vm2 = vcmask 31744  }
   0xe   :  { %369 = vmatprep.subr.mxu0 %v485_v0  ;;  %371 = vmatprep.mubr.msk.f32.mxu0 %vm486_vm0, %v485_v0  ;;  %v29_v1 = vld [vmem:[%s560_s1] sm:$0xf]  ;;  %v129_v3 = vld [vmem:[#allocation2 + $0x78] sm:$0xff]  ;;  %v128_v4 = vld [vmem:[#allocation2 + $0x70] sm:$0xff]  ;;  %v316_v62 = vlaneseq }
   0xf   :  { %374 = vmatprep.subr.mxu1 %v485_v0  ;;  %406 = vmatprep.mubr.msk.f32.mxu1 %vm486_vm0, %v485_v0  ;;  %v28_v2 = vld [vmem:[%s559_s0] sm:$0xff]  ;;  %v127_v5 = vld [vmem:[#allocation2 + $0x68] sm:$0xff]  ;;  %v125_v7 = vld [vmem:[#allocation2 + $0x58] sm:$0xff]  ;;  %s487_s0 = smov 64  }
  0x10   :  { %370 = vmatpush3.msk.msra.mxu0 %vm39_vm1, %v29_v1  ;;  %375 = vmatpush3.msra.mxu1 %v129_v3  ;;  %v126_v6 = vld [vmem:[#allocation2 + $0x60] sm:$0xff]  ;;  %v124_v8 = vld [vmem:[#allocation2 + $0x50] sm:$0xff]  ;;  %v123_v9 = vld [vmem:[#allocation2 + $0x48] sm:$0xff]  ;;  %v317_v63 = vand.u32 127, %v316_v62 }
  0x11   :  { %372 = vmatmul.mubr.msk.f32.vlgmr.msra.gmra.mxu0 %vm35_vm2, %v28_v2  ;;  %376 = vmatprep.subr.mxu1 %v485_v0  ;;  %v122_v10 = vld [vmem:[#allocation2 + $0x40] sm:$0xff]  ;;  %v121_v11 = vld [vmem:[#allocation2 + $0x38] sm:$0xff]  ;;  %v120_v12 = vld [vmem:[#allocation2 + $0x30] sm:$0xff] }
  0x12   :  { %377 = vmatpush3.msra.mxu1 %v128_v4  ;;  %409 = vmatprep.subr.mxu0 %v485_v0  ;;  %v119_v13 = vld [vmem:[#allocation2 + $0x28] sm:$0xff]  ;;  %v118_v14 = vld [vmem:[#allocation2 + $0x20] sm:$0xff]  ;;  %v117_v15 = vld [vmem:[#allocation2 + $0x18] sm:$0xff]  ;;  %vm319_vm3 = vcmp.eq.s32.totalorder %v317_v63, 2  ;;  %vm318_vm4 = vcmp.lt.s32.totalorder %v317_v63, 2 }
  0x13   :  { %378 = vmatprep.subr.mxu1 %v485_v0  ;;  %441 = vmatprep.mubr.msk.f32.mxu0 %vm486_vm0, %v485_v0  ;;  %v116_v16 = vld [vmem:[#allocation2 + $0x10] sm:$0xff]  ;;  %v115_v17 = vld [vmem:[#allocation2 + $0x8] sm:$0xff]  ;;  %v114_v18 = vld [vmem:[#allocation2] sm:$0xff] }
  0x14   :  { %379 = vmatpush3.msra.mxu1 %v127_v5  ;;  %v221_v19 = vld [vmem:[#allocation2 + $0xf8] sm:$0xff]  ;;  %v220_v20 = vld [vmem:[#allocation2 + $0xf0] sm:$0xff]  ;;  %v219_v21 = vld [vmem:[#allocation2 + $0xe8] sm:$0xff] }
  0x15   :  { %380 = vmatprep.subr.mxu1 %v485_v0  ;;  %410 = vmatpush3.msra.mxu0 %v221_v19  ;;  %v218_v22 = vld [vmem:[#allocation2 + $0xe0] sm:$0xff]  ;;  %v217_v23 = vld [vmem:[#allocation2 + $0xd8] sm:$0xff]  ;;  %v216_v24 = vld [vmem:[#allocation2 + $0xd0] sm:$0xff] }
  0x16   :  { %381 = vmatpush3.msra.mxu1 %v126_v6  ;;  %411 = vmatprep.subr.mxu0 %v485_v0  ;;  %v215_v25 = vld [vmem:[#allocation2 + $0xc8] sm:$0xff]  ;;  %v214_v26 = vld [vmem:[#allocation2 + $0xc0] sm:$0xff]  ;;  %v213_v27 = vld [vmem:[#allocation2 + $0xb8] sm:$0xff] }
  0x17   :  { %382 = vmatprep.subr.mxu1 %v485_v0  ;;  %412 = vmatpush3.msra.mxu0 %v220_v20  ;;  %v212_v28 = vld [vmem:[#allocation2 + $0xb0] sm:$0xff]  ;;  %v211_v29 = vld [vmem:[#allocation2 + $0xa8] sm:$0xff]  ;;  %v210_v30 = vld [vmem:[#allocation2 + $0xa0] sm:$0xff] }
  0x18   :  { %383 = vmatpush3.msra.mxu1 %v125_v7  ;;  %413 = vmatprep.subr.mxu0 %v485_v0  ;;  %v209_v31 = vld [vmem:[#allocation2 + $0x98] sm:$0xff]  ;;  %v328_v32 = vld [vmem:[#allocation2 + $0x100] ss:$0 sm:$0xff]  ;;  %v208_v37 = vld [vmem:[#allocation2 + $0x90] sm:$0xff] }
  0x19   :  { %384 = vmatprep.subr.mxu1 %v485_v0  ;;  %414 = vmatpush3.msra.mxu0 %v219_v21  ;;  %v207_v38 = vld [vmem:[#allocation2 + $0x88] sm:$0xff]  ;;  %v206_v39 = vld [vmem:[#allocation2 + $0x80] sm:$0xff] }
  0x1a   :  { %385 = vmatpush3.msra.mxu1 %v124_v8  ;;  %415 = vmatprep.subr.mxu0 %v485_v0  ;;  %v331_v40 = vld [vmem:[#allocation2 + $0x101] ss:$0 sm:$0xff]  ;;  %v332_v45 = vld [vmem:[#allocation2 + $0x102] ss:$0 sm:$0xff] }
  0x1b   :  { %386 = vmatprep.subr.mxu1 %v485_v0  ;;  %416 = vmatpush3.msra.mxu0 %v218_v22 }
  0x1c   :  { %387 = vmatpush3.msra.mxu1 %v123_v9  ;;  %417 = vmatprep.subr.mxu0 %v485_v0 }
  0x1d   :  { %388 = vmatprep.subr.mxu1 %v485_v0  ;;  %418 = vmatpush3.msra.mxu0 %v217_v23 }
  0x1e   :  { %389 = vmatpush3.msra.mxu1 %v122_v10  ;;  %419 = vmatprep.subr.mxu0 %v485_v0 }
  0x1f   :  { %390 = vmatprep.subr.mxu1 %v485_v0  ;;  %420 = vmatpush3.msra.mxu0 %v216_v24 }
  0x20   :  { %391 = vmatpush3.msra.mxu1 %v121_v11  ;;  %421 = vmatprep.subr.mxu0 %v485_v0 }
  0x21   :  { %392 = vmatprep.subr.mxu1 %v485_v0  ;;  %422 = vmatpush3.msra.mxu0 %v215_v25 }
  0x22   :  { %393 = vmatpush3.msra.mxu1 %v120_v12  ;;  %423 = vmatprep.subr.mxu0 %v485_v0 }
  0x23   :  { %394 = vmatprep.subr.mxu1 %v485_v0  ;;  %424 = vmatpush3.msra.mxu0 %v214_v26 }
  0x24   :  { %395 = vmatpush3.msra.mxu1 %v119_v13  ;;  %425 = vmatprep.subr.mxu0 %v485_v0 }
  0x25   :  { %396 = vmatprep.subr.mxu1 %v485_v0  ;;  %426 = vmatpush3.msra.mxu0 %v213_v27 }
  0x26   :  { %397 = vmatpush3.msra.mxu1 %v118_v14  ;;  %427 = vmatprep.subr.mxu0 %v485_v0 }
  0x27   :  { %398 = vmatprep.subr.mxu1 %v485_v0  ;;  %428 = vmatpush3.msra.mxu0 %v212_v28 }
  0x28   :  { %399 = vmatpush3.msra.mxu1 %v117_v15  ;;  %429 = vmatprep.subr.mxu0 %v485_v0 }
  0x29   :  { %400 = vmatprep.subr.mxu1 %v485_v0  ;;  %430 = vmatpush3.msra.mxu0 %v211_v29 }
  0x2a   :  { %401 = vmatpush3.msra.mxu1 %v116_v16  ;;  %431 = vmatprep.subr.mxu0 %v485_v0 }
  0x2b   :  { %402 = vmatprep.subr.mxu1 %v485_v0  ;;  %432 = vmatpush3.msra.mxu0 %v210_v30 }
  0x2c   :  { %403 = vmatpush3.msra.mxu1 %v115_v17  ;;  %433 = vmatprep.subr.mxu0 %v485_v0 }
  0x2d   :  { %404 = vmatprep.subr.mxu1 %v485_v0  ;;  %434 = vmatpush3.msra.mxu0 %v209_v31 }
  0x2e   :  { %405 = vmatpush3.msra.mxu1 %v114_v18  ;;  %435 = vmatprep.subr.mxu0 %v485_v0 }
  0x2f   :  { %436 = vmatpush3.msra.mxu0 %v208_v37 }
  0x30   :  { %437 = vmatprep.subr.mxu0 %v485_v0 }
  0x31   :  { %438 = vmatpush3.msra.mxu0 %v207_v38 }
  0x32   :  { %439 = vmatprep.subr.mxu0 %v485_v0 }
  0x33   :  { %440 = vmatpush3.msra.mxu0 %v206_v39 }
  0xd1   :  { %v109_v33 = vpop.f32.mrf.mxu0 }
  0xd2   :  { %v110_v34 = vadd.f32 %v328_v32, %v109_v33 }
  0xd3   :  { %v373_v35 = vpop.f32.mrf.mxu0 }
  0xd4   :  { %v113_v36 = vmax.f32 %v110_v34, 0.0 }
  0xd6   :  { %407 = vmatmul.mubr.f32.vlgmr.msra.gmra.mxu1 %v113_v36 }
 0x196   :  { %v201_v41 = vpop.f32.mrf.mxu1 }
 0x197   :  { %v202_v42 = vadd.f32 %v331_v40, %v201_v41 }
 0x198   :  { %v408_v43 = vpop.f32.mrf.mxu1 }
 0x199   :  { %v205_v44 = vmax.f32 %v202_v42, 0.0 }
 0x19b   :  { %442 = vmatmul.mubr.f32.vlgmr.msra.gmra.mxu0 %v205_v44 }
 0x25b   :  { %v293_v46 = vpop.f32.mrf.mxu0 }
 0x25c   :  { %v294_v47 = vadd.f32 %v332_v45, %v293_v46 }
 0x25d   :  { %v443_v48 = vpop.f32.mrf.mxu0 }
 0x25e   :  { %297 = vrot.lane.b32.xlu0 %v294_v47, %s487_s0  ;;  %v311_v49 = vsub.f32 0.0, %v294_v47 }
 0x260   :  { %v312_v52 = vmul.f32 1.442695, %v311_v49 }
 0x262   :  { %450 = vpow2.f32 %v312_v52 }
 0x26f   :  { %v451_v57 = vpop.eup %450 }
 0x270   :  { %v314_v61 = vadd.f32 1.0, %v451_v57 }
 0x2d0   :  { %v298_v50 = vpop.permute.xlu0 %297 }
 0x2d1   :  { %v299_v51 = vmax.f32 %v294_v47, %v298_v50 }
 0x2d3   :  { %v300_v53 = vsub.f32 %v294_v47, %v299_v51  ;;  %v303_v54 = vsub.f32 %v298_v50, %v299_v51 }
 0x2d5   :  { %v301_v55 = vmul.f32 1.442695, %v300_v53  ;;  %v304_v56 = vmul.f32 1.442695, %v303_v54 }
 0x2d7   :  { %452 = vpow2.f32 %v301_v55 }
 0x2d8   :  { %454 = vpow2.f32 %v304_v56 }
 0x2e4   :  { %v453_v58 = vpop.eup %452 }
 0x2e5   :  { %v455_v59 = vpop.eup %454 }
 0x2e6   :  { %v306_v60 = vadd.f32 %v455_v59, %v453_v58 }
 0x2e8   :  { %456 = vlog2.f32 %v306_v60 }
 0x2e9   :  { %458 = vrcp.f32 %v314_v61 }
 0x2f5   :  { %v457_v0 = vpop.eup %456 }
 0x2f6   :  { %v308_v1 = vmul.f32 0.6931472, %v457_v0  ;;  %v459_v2 = vpop.eup %458 }
 0x2f7   :  { %v320_v5 = vsel %vm319_vm3, %v459_v2, 0.0 }
 0x2f8   :  { %v309_v3 = vadd.f32 %v308_v1, %v299_v51 }
 0x2fa   :  { %v310_v4 = vsub.f32 %v294_v47, %v309_v3 }
 0x2fc   :  { %v321_v6 = vsel %vm318_vm4, %v310_v4, %v320_v5 }
 0x2fd   :  { %322 = vst [vmem:[%s562_s3] sm:$0xff] %v321_v6 }
 0x2fe   :  { %327 = vsyncpa [#allocation3], 1 }

</bundles_post_ra>
